<compile_context>
chip_gen: v7x
topology: tpu7x:2x2x1
jax: 0.10.0
libtpu: 0.0.40
codegen_flags: <defaults>
</compile_context>

<pallas_src>
import math

import jax
import jax.numpy as jnp
from jax.experimental import pallas as pl
from jax.experimental.pallas import tpu as pltpu

FREQ_DIM = 256          # frequency_embedding_size of TimestepEmbedder
MAX_PERIOD = 10000.0


def _silu(x):
    return x * (1.0 / (1.0 + jnp.exp(-x)))


# ----------------------------------------------------------------------------
# Stage 1: embedded_timestep = Linear(SiLU(Linear(sinusoidal(t)))), plus
# s = SiLU(embedded_timestep) pre-cast to the weight dtype for stage 2.
# Gridded over w2's output columns so [D, D] never has to be VMEM-resident.
# ----------------------------------------------------------------------------
def timestep_embed_kernel(t_ref, freqs_ref, w1_ref, b1_ref, w2_ref, b2_ref,
                          emb_ref, s_ref):
    # sinusoidal embedding (freqs row precomputed in the wrapper)
    args = t_ref[...] * freqs_ref[...]                                 # [B, 128]
    t_freq = jnp.concatenate([jnp.cos(args), jnp.sin(args)], axis=-1)  # [B, 256]

    # hidden = SiLU(t_freq @ w1 + b1): tiny, recomputed per grid step so the
    # grid axis stays "parallel" (no scratch carry); hidden under the w2 DMA.
    h = _silu(jnp.dot(t_freq.astype(w1_ref.dtype), w1_ref[...],
                      preferred_element_type=jnp.float32) + b1_ref[...])

    emb = jnp.dot(h.astype(w2_ref.dtype), w2_ref[...],
                  preferred_element_type=jnp.float32) + b2_ref[...]
    emb_ref[...] = emb
    s_ref[...] = _silu(emb).astype(s_ref.dtype)


# ----------------------------------------------------------------------------
# Stage 2: out = s @ w3 + b3 with w3 [D, 6D] streamed tile-by-tile over the 6D
# output axis.  s (SiLU(emb), already weight-dtype) stays VMEM-resident.
# ----------------------------------------------------------------------------
def adaln_proj_kernel(s_ref, w3_ref, b3_ref, out_ref):
    out_ref[...] = jnp.dot(s_ref[...], w3_ref[...],
                           preferred_element_type=jnp.float32) + b3_ref[...]


# ----------------------------------------------------------------------------
# Generation-aware sizing helpers
# ----------------------------------------------------------------------------
def _vmem_budget_bytes():
    """Scoped-VMEM request cap: ~80% of physical VMEM, never above 100 MiB."""
    cap = 64 << 20  # conservative fallback (v7x-sized)
    try:
        cap = int(pltpu.get_tpu_info().vmem_capacity_bytes)
    except Exception:
        pass
    return min(int(cap * 0.8), 100 << 20)


def _num_tensorcores():
    """Heuristic TCs-per-chip (v7x has 2); perf-only, safe to get wrong."""
    try:
        kind = jax.devices()[0].device_kind.lower()
    except Exception:
        return 1
    return 2 if ("v7" in kind or "7x" in kind) else 1


def _pick_stream_tile(n_cols, bytes_per_col, budget, num_cores):
    """Largest tile (multiple of 128 dividing n_cols) whose double-buffered
    stream fits `budget`, preferring a step count that splits evenly across
    `num_cores` with >=2 steps/core (megacore balance + DMA overlap)."""
    if n_cols % 128 != 0:
        return n_cols                      # small/unaligned: one full block
    cands = []
    for k in range(1, n_cols // 128 + 1):
        tn = 128 * k
        if n_cols % tn == 0 and 2 * bytes_per_col * tn <= budget:
            cands.append(tn)
    if not cands:
        return 128
    nc = max(num_cores, 1)
    for min_per_core, need_even_split in ((2, True), (1, True), (1, False)):
        good = [tn for tn in cands
                if (n_cols // tn) >= min_per_core * nc
                and (not need_even_split or (n_cols // tn) % nc == 0)]
        if good:
            return max(good)
    return max(cands)


# ----------------------------------------------------------------------------
# Wrapper
# ----------------------------------------------------------------------------
def prepare_params(params, weight_dtype=jnp.bfloat16):
    """One-time weight conversion (do this at model load, NOT per call).

    The projection kernel is HBM-bandwidth bound on w3; shipping weights as
    bf16 halves the DMA bytes.  Biases stay f32; matmuls accumulate in f32."""
    out = dict(params)
    for k in ("w1", "w2", "w3"):
        out[k] = params[k].astype(weight_dtype)
    return out


def ada_layer_norm_single(timestep, params, time_step_rescale=1000.0):
    """timestep: [B]. Returns (out [B, 6D] f32, embedded_timestep [B, D] f32).

    `params` weights are used in whatever dtype they carry (use prepare_params
    once to cache them as bf16)."""
    B = timestep.shape[0]
    D = params["w2"].shape[0]
    N = 6 * D
    half = FREQ_DIM // 2
    wdtype = params["w3"].dtype
    wb = jnp.dtype(wdtype).itemsize

    t = (timestep.astype(jnp.float32) * time_step_rescale).reshape(B, 1)
    freqs = jnp.exp((-math.log(MAX_PERIOD) / half)
                    * jnp.arange(half, dtype=jnp.float32)).reshape(1, half)

    budget = _vmem_budget_bytes()
    ncores = _num_tensorcores()
    stream_budget = int(budget * 0.6)      # share for the double-buffered stream

    # ---- stage 1: embedded_timestep (+ SiLU(emb) pre-cast) ----------------
    per_col1 = wb * D + 4 + B * 4 + B * wb           # w2 col + b2 + emb + s
    TD = _pick_stream_tile(D, per_col1, stream_budget, ncores)
    need1 = 2 * (B * 4 + half * 4 + FREQ_DIM * D * wb + D * 4
                 + per_col1 * TD) + (4 << 20)
    emb, s = pl.pallas_call(
        timestep_embed_kernel,
        out_shape=(jax.ShapeDtypeStruct((B, D), jnp.float32),
                   jax.ShapeDtypeStruct((B, D), wdtype)),
        grid_spec=pltpu.PrefetchScalarGridSpec(
            num_scalar_prefetch=0,
            grid=(D // TD,),
            in_specs=[pl.BlockSpec((B, 1), lambda j: (0, 0)),        # t
                      pl.BlockSpec((1, half), lambda j: (0, 0)),     # freqs
                      pl.BlockSpec((FREQ_DIM, D), lambda j: (0, 0)), # w1 resident
                      pl.BlockSpec((1, D), lambda j: (0, 0)),        # b1
                      pl.BlockSpec((D, TD), lambda j: (0, j)),       # w2 tile
                      pl.BlockSpec((1, TD), lambda j: (0, j))],      # b2 tile
            out_specs=[pl.BlockSpec((B, TD), lambda j: (0, j)),      # emb
                       pl.BlockSpec((B, TD), lambda j: (0, j))],     # silu(emb)
        ),
        compiler_params=pltpu.CompilerParams(
            dimension_semantics=("parallel",),
            vmem_limit_bytes=int(min(max(need1, 16 << 20), budget))),
        cost_estimate=pl.CostEstimate(
            flops=2 * B * (FREQ_DIM * D + D * D),
            bytes_accessed=FREQ_DIM * D * wb + D * D * wb + 2 * D * 4
                           + B * D * (4 + wb),
            transcendentals=B * (FREQ_DIM + 2 * D)),
    )(t, freqs, params["w1"], params["b1"], params["w2"], params["b2"])

    # ---- stage 2: adaLN projection, streamed over the 6D axis --------------
    per_col2 = wb * D + 4 + B * 4                    # w3 col + b3 + out
    TN = _pick_stream_tile(N, per_col2, stream_budget, ncores)
    need2 = 2 * (B * D * wb + per_col2 * TN) + (4 << 20)
    out = pl.pallas_call(
        adaln_proj_kernel,
        out_shape=jax.ShapeDtypeStruct((B, N), jnp.float32),
        grid_spec=pltpu.PrefetchScalarGridSpec(
            num_scalar_prefetch=0,
            grid=(N // TN,),
            in_specs=[pl.BlockSpec((B, D), lambda j: (0, 0)),   # s, resident
                      pl.BlockSpec((D, TN), lambda j: (0, j)),  # w3 tile (streamed)
                      pl.BlockSpec((1, TN), lambda j: (0, j))], # b3 tile
            out_specs=pl.BlockSpec((B, TN), lambda j: (0, j)),
        ),
        compiler_params=pltpu.CompilerParams(
            dimension_semantics=("parallel",),  # shard w3 tiles over v7x's 2 TCs
            vmem_limit_bytes=int(min(max(need2, 16 << 20), budget))),
        cost_estimate=pl.CostEstimate(
            flops=2 * B * D * N,
            bytes_accessed=D * N * wb + N * 4 + B * D * wb + B * N * 4,
            transcendentals=0),
    )(s, params["w3"], params["b3"])

    return out, emb


def init_params(key, embedding_dim):
    """Deterministic synthetic parameters (shapes from the module __init__)."""
    D = embedding_dim
    ks = jax.random.split(key, 6)
    scale1 = 1.0 / math.sqrt(FREQ_DIM)
    scale2 = 1.0 / math.sqrt(D)
    return {
        "w1": jax.random.normal(ks[0], (FREQ_DIM, D), jnp.float32) * scale1,
        "b1": jax.random.normal(ks[1], (1, D), jnp.float32) * 0.01,
        "w2": jax.random.normal(ks[2], (D, D), jnp.float32) * scale2,
        "b2": jax.random.normal(ks[3], (1, D), jnp.float32) * 0.01,
        "w3": jax.random.normal(ks[4], (D, 6 * D), jnp.float32) * scale2,
        "b3": jax.random.normal(ks[5], (1, 6 * D), jnp.float32) * 0.01,
    }


def _reference(timestep, params, time_step_rescale=1000.0, wdtype=jnp.float32):
    """Pure-JAX reference mirroring the PyTorch forward.

    `wdtype=jnp.bfloat16` mirrors the kernel's bf16-weight numerics exactly."""
    t = timestep.astype(jnp.float32) * time_step_rescale
    half = FREQ_DIM // 2
    freqs = jnp.exp(-math.log(MAX_PERIOD) * jnp.arange(half, dtype=jnp.float32) / half)
    args = t[:, None] * freqs[None, :]
    t_freq = jnp.concatenate([jnp.cos(args), jnp.sin(args)], axis=-1)

    def lin(x, w, b):
        return jnp.dot(x.astype(wdtype), w.astype(wdtype),
                       preferred_element_type=jnp.float32) + b

    h = lin(t_freq, params["w1"], params["b1"])
    h = h * jax.nn.sigmoid(h)
    emb = lin(h, params["w2"], params["b2"])
    s = emb * jax.nn.sigmoid(emb)
    out = lin(s, params["w3"], params["b3"])
    return out, emb


if __name__ == "__main__":
    B, D = 4, 32  # small demo shapes: batch of 4 timesteps, embedding_dim=32

    key = jax.random.PRNGKey(0)
    kp, kt = jax.random.split(key)
    params_f32 = init_params(kp, D)
    params = prepare_params(params_f32)       # one-time bf16 weight cache
    timestep = jax.random.uniform(kt, (B,), jnp.float32)  # diffusion timesteps

    fwd = jax.jit(ada_layer_norm_single)
    out, emb = fwd(timestep, params)
    jax.block_until_ready((out, emb))

    assert out.shape == (B, 6 * D) and emb.shape == (B, D)
    assert out.dtype == jnp.float32 and emb.dtype == jnp.float32

    # Exact-numerics check (reference with the same one-time bf16 weight cast).
    ref_out_bf, ref_emb_bf = _reference(timestep, params_f32, wdtype=jnp.bfloat16)
    assert jnp.allclose(emb, ref_emb_bf, atol=1e-3, rtol=1e-3)
    assert jnp.allclose(out, ref_out_bf, atol=1e-3, rtol=1e-3)

    # Loose sanity check against the full-f32 module semantics.
    # TODO(synk): bf16 weights match torch f32 semantics only to ~5e-2; keep
    # params in f32 (skip prepare_params) if bit-tighter parity is required.
    ref_out, ref_emb = _reference(timestep, params_f32)
    assert jnp.allclose(emb, ref_emb, atol=5e-2, rtol=5e-2)
    assert jnp.allclose(out, ref_out, atol=5e-2, rtol=5e-2)

    print("KERNEL_OK")
</pallas_src>

<mosaic_0001>
module attributes {stable_mosaic.version = 11 : i64} {
  func.func @adaln_proj_kernel(%arg0: i32, %arg1: memref<4x32xbf16, #tpu.memory_space<vmem>>, %arg2: memref<32x192xbf16, #tpu.memory_space<vmem>>, %arg3: memref<1x192xf32, #tpu.memory_space<vmem>>, %arg4: memref<4x192xf32, #tpu.memory_space<vmem>>) attributes {dimension_semantics = [#tpu.dimension_semantics<parallel>], iteration_bounds = array<i64: 1>, scalar_prefetch = 0 : i64, scratch_operands = 0 : i64, tpu.core_type = #tpu.core_type<tc>, window_params = [{pipeline_mode = #tpu.pipeline_mode<synchronous>, transform_indices = @transform_0, window_bounds = array<i64: 4, 32>}, {transform_indices = @transform_1, window_bounds = array<i64: 32, 192>}, {transform_indices = @transform_2, window_bounds = array<i64: 1, 192>}, {transform_indices = @transform_3, window_bounds = array<i64: 4, 192>}]} {
    %c0 = arith.constant 0 : index
    %c0_0 = arith.constant 0 : index
    %0 = vector.load %arg1[%c0, %c0_0] : memref<4x32xbf16, #tpu.memory_space<vmem>>, vector<4x32xbf16>
    %c0_1 = arith.constant 0 : index
    %c0_2 = arith.constant 0 : index
    %1 = vector.load %arg2[%c0_1, %c0_2] : memref<32x192xbf16, #tpu.memory_space<vmem>>, vector<32x192xbf16>
    %cst = arith.constant dense<0.000000e+00> : vector<4x192xf32>
    %2 = tpu.matmul %0, %1, %cst {dimension_numbers = #tpu.dot_dimension_numbers<[1], [0], [0], [1], [0, 0, 1, 1], [], []>} : vector<4x32xbf16>, vector<32x192xbf16>, vector<4x192xf32> -> vector<4x192xf32>
    %c0_3 = arith.constant 0 : index
    %c0_4 = arith.constant 0 : index
    %3 = vector.load %arg3[%c0_3, %c0_4] : memref<1x192xf32, #tpu.memory_space<vmem>>, vector<1x192xf32>
    %4 = vector.broadcast %3 : vector<1x192xf32> to vector<4x192xf32>
    %5 = arith.addf %2, %4 : vector<4x192xf32>
    %c0_5 = arith.constant 0 : index
    %c0_6 = arith.constant 0 : index
    %6 = vector.load %arg4[%c0_5, %c0_6] : memref<4x192xf32, #tpu.memory_space<vmem>>, vector<4x192xf32>
    tpu.vector_store %arg4[%c0_5, %c0_6], %5 {strides = array<i32>} : memref<4x192xf32, #tpu.memory_space<vmem>>, vector<4x192xf32>,
    return
  }
  func.func @transform_0(%arg0: i32) -> (i32, i32) {
    %c0_i32 = arith.constant 0 : i32
    %c0_i32_0 = arith.constant 0 : i32
    %c0_i32_1 = arith.constant 0 : i32
    return %c0_i32, %c0_i32_0 : i32, i32
  }
  func.func @transform_1(%arg0: i32) -> (i32, i32) {
    %c0_i32 = arith.constant 0 : i32
    %c0_i32_0 = arith.constant 0 : i32
    return %c0_i32, %arg0 : i32, i32
  }
  func.func @transform_2(%arg0: i32) -> (i32, i32) {
    %c0_i32 = arith.constant 0 : i32
    %c0_i32_0 = arith.constant 0 : i32
    return %c0_i32, %arg0 : i32, i32
  }
  func.func @transform_3(%arg0: i32) -> (i32, i32) {
    %c0_i32 = arith.constant 0 : i32
    %c0_i32_0 = arith.constant 0 : i32
    return %c0_i32, %arg0 : i32, i32
  }
}

module attributes {stable_mosaic.version = 11 : i64} {
  func.func @timestep_embed_kernel(%arg0: i32, %arg1: memref<4x1xf32, #tpu.memory_space<vmem>>, %arg2: memref<1x128xf32, #tpu.memory_space<vmem>>, %arg3: memref<256x32xbf16, #tpu.memory_space<vmem>>, %arg4: memref<1x32xf32, #tpu.memory_space<vmem>>, %arg5: memref<32x32xbf16, #tpu.memory_space<vmem>>, %arg6: memref<1x32xf32, #tpu.memory_space<vmem>>, %arg7: memref<4x32xf32, #tpu.memory_space<vmem>>, %arg8: memref<4x32xbf16, #tpu.memory_space<vmem>>) attributes {dimension_semantics = [#tpu.dimension_semantics<parallel>], iteration_bounds = array<i64: 1>, scalar_prefetch = 0 : i64, scratch_operands = 0 : i64, tpu.core_type = #tpu.core_type<tc>, window_params = [{pipeline_mode = #tpu.pipeline_mode<synchronous>, transform_indices = @transform_0, window_bounds = array<i64: 4, 1>}, {pipeline_mode = #tpu.pipeline_mode<synchronous>, transform_indices = @transform_1, window_bounds = array<i64: 1, 128>}, {pipeline_mode = #tpu.pipeline_mode<synchronous>, transform_indices = @transform_2, window_bounds = array<i64: 256, 32>}, {pipeline_mode = #tpu.pipeline_mode<synchronous>, transform_indices = @transform_3, window_bounds = array<i64: 1, 32>}, {transform_indices = @transform_4, window_bounds = array<i64: 32, 32>}, {transform_indices = @transform_5, window_bounds = array<i64: 1, 32>}, {transform_indices = @transform_6, window_bounds = array<i64: 4, 32>}, {transform_indices = @transform_7, window_bounds = array<i64: 4, 32>}]} {
    %c0 = arith.constant 0 : index
    %c0_0 = arith.constant 0 : index
    %0 = vector.load %arg1[%c0, %c0_0] : memref<4x1xf32, #tpu.memory_space<vmem>>, vector<4x1xf32>
    %c0_1 = arith.constant 0 : index
    %c0_2 = arith.constant 0 : index
    %1 = vector.load %arg2[%c0_1, %c0_2] : memref<1x128xf32, #tpu.memory_space<vmem>>, vector<1x128xf32>
    %2 = vector.broadcast %0 : vector<4x1xf32> to vector<4x128xf32>
    %3 = vector.broadcast %1 : vector<1x128xf32> to vector<4x128xf32>
    %4 = arith.mulf %2, %3 : vector<4x128xf32>
    %5 = math.cos %4 : vector<4x128xf32>
    %6 = math.sin %4 : vector<4x128xf32>
    %7 = tpu.concatenate %5, %6 in 1 : vector<4x128xf32>, vector<4x128xf32> -> vector<4x256xf32>
    %8 = arith.truncf %7 : vector<4x256xf32> to vector<4x256xbf16>
    %c0_3 = arith.constant 0 : index
    %c0_4 = arith.constant 0 : index
    %9 = vector.load %arg3[%c0_3, %c0_4] : memref<256x32xbf16, #tpu.memory_space<vmem>>, vector<256x32xbf16>
    %cst = arith.constant dense<0.000000e+00> : vector<4x32xf32>
    %10 = tpu.matmul %8, %9, %cst {dimension_numbers = #tpu.dot_dimension_numbers<[1], [0], [0], [1], [0, 0, 1, 1], [], []>} : vector<4x256xbf16>, vector<256x32xbf16>, vector<4x32xf32> -> vector<4x32xf32>
    %c0_5 = arith.constant 0 : index
    %c0_6 = arith.constant 0 : index
    %11 = vector.load %arg4[%c0_5, %c0_6] : memref<1x32xf32, #tpu.memory_space<vmem>>, vector<1x32xf32>
    %12 = vector.broadcast %11 : vector<1x32xf32> to vector<4x32xf32>
    %13 = arith.addf %10, %12 : vector<4x32xf32>
    %cst_7 = arith.constant 0.000000e+00 : f32
    %14 = vector.broadcast %cst_7 : f32 to vector<4x32xf32>
    %15 = arith.subf %14, %13 : vector<4x32xf32>
    %16 = math.exp %15 : vector<4x32xf32>
    %cst_8 = arith.constant 1.000000e+00 : f32
    %17 = vector.broadcast %cst_8 : f32 to vector<4x32xf32>
    %18 = arith.addf %17, %16 : vector<4x32xf32>
    %cst_9 = arith.constant 1.000000e+00 : f32
    %19 = vector.broadcast %cst_9 : f32 to vector<4x32xf32>
    %20 = arith.divf %19, %18 : vector<4x32xf32>
    %21 = arith.mulf %13, %20 : vector<4x32xf32>
    %22 = arith.truncf %21 : vector<4x32xf32> to vector<4x32xbf16>
    %c0_10 = arith.constant 0 : index
    %c0_11 = arith.constant 0 : index
    %23 = vector.load %arg5[%c0_10, %c0_11] : memref<32x32xbf16, #tpu.memory_space<vmem>>, vector<32x32xbf16>
    %cst_12 = arith.constant dense<0.000000e+00> : vector<4x32xf32>
    %24 = tpu.matmul %22, %23, %cst_12 {dimension_numbers = #tpu.dot_dimension_numbers<[1], [0], [0], [1], [0, 0, 1, 1], [], []>} : vector<4x32xbf16>, vector<32x32xbf16>, vector<4x32xf32> -> vector<4x32xf32>
    %c0_13 = arith.constant 0 : index
    %c0_14 = arith.constant 0 : index
    %25 = vector.load %arg6[%c0_13, %c0_14] : memref<1x32xf32, #tpu.memory_space<vmem>>, vector<1x32xf32>
    %26 = vector.broadcast %25 : vector<1x32xf32> to vector<4x32xf32>
    %27 = arith.addf %24, %26 : vector<4x32xf32>
    %c0_15 = arith.constant 0 : index
    %c0_16 = arith.constant 0 : index
    %28 = vector.load %arg7[%c0_15, %c0_16] : memref<4x32xf32, #tpu.memory_space<vmem>>, vector<4x32xf32>
    tpu.vector_store %arg7[%c0_15, %c0_16], %27 {strides = array<i32>} : memref<4x32xf32, #tpu.memory_space<vmem>>, vector<4x32xf32>,
    %cst_17 = arith.constant 0.000000e+00 : f32
    %29 = vector.broadcast %cst_17 : f32 to vector<4x32xf32>
    %30 = arith.subf %29, %27 : vector<4x32xf32>
    %31 = math.exp %30 : vector<4x32xf32>
    %cst_18 = arith.constant 1.000000e+00 : f32
    %32 = vector.broadcast %cst_18 : f32 to vector<4x32xf32>
    %33 = arith.addf %32, %31 : vector<4x32xf32>
    %cst_19 = arith.constant 1.000000e+00 : f32
    %34 = vector.broadcast %cst_19 : f32 to vector<4x32xf32>
    %35 = arith.divf %34, %33 : vector<4x32xf32>
    %36 = arith.mulf %27, %35 : vector<4x32xf32>
    %37 = arith.truncf %36 : vector<4x32xf32> to vector<4x32xbf16>
    %c0_20 = arith.constant 0 : index
    %c0_21 = arith.constant 0 : index
    %38 = vector.load %arg8[%c0_20, %c0_21] : memref<4x32xbf16, #tpu.memory_space<vmem>>, vector<4x32xbf16>
    tpu.vector_store %arg8[%c0_20, %c0_21], %37 {strides = array<i32>} : memref<4x32xbf16, #tpu.memory_space<vmem>>, vector<4x32xbf16>,
    return
  }
  func.func @transform_0(%arg0: i32) -> (i32, i32) {
    %c0_i32 = arith.constant 0 : i32
    %c0_i32_0 = arith.constant 0 : i32
    %c0_i32_1 = arith.constant 0 : i32
    return %c0_i32, %c0_i32_0 : i32, i32
  }
  func.func @transform_1(%arg0: i32) -> (i32, i32) {
    %c0_i32 = arith.constant 0 : i32
    %c0_i32_0 = arith.constant 0 : i32
    %c0_i32_1 = arith.constant 0 : i32
    return %c0_i32, %c0_i32_0 : i32, i32
  }
  func.func @transform_2(%arg0: i32) -> (i32, i32) {
    %c0_i32 = arith.constant 0 : i32
    %c0_i32_0 = arith.constant 0 : i32
    %c0_i32_1 = arith.constant 0 : i32
    return %c0_i32, %c0_i32_0 : i32, i32
  }
  func.func @transform_3(%arg0: i32) -> (i32, i32) {
    %c0_i32 = arith.constant 0 : i32
    %c0_i32_0 = arith.constant 0 : i32
    %c0_i32_1 = arith.constant 0 : i32
    return %c0_i32, %c0_i32_0 : i32, i32
  }
  func.func @transform_4(%arg0: i32) -> (i32, i32) {
    %c0_i32 = arith.constant 0 : i32
    %c0_i32_0 = arith.constant 0 : i32
    return %c0_i32, %arg0 : i32, i32
  }
  func.func @transform_5(%arg0: i32) -> (i32, i32) {
    %c0_i32 = arith.constant 0 : i32
    %c0_i32_0 = arith.constant 0 : i32
    return %c0_i32, %arg0 : i32, i32
  }
  func.func @transform_6(%arg0: i32) -> (i32, i32) {
    %c0_i32 = arith.constant 0 : i32
    %c0_i32_0 = arith.constant 0 : i32
    return %c0_i32, %arg0 : i32, i32
  }
  func.func @transform_7(%arg0: i32) -> (i32, i32) {
    %c0_i32 = arith.constant 0 : i32
    %c0_i32_0 = arith.constant 0 : i32
    return %c0_i32, %arg0 : i32, i32
  }
}

</mosaic_0001>

<bundles_post_ra>
// kernel: ada_layer_norm_single.3
= control target key start
LH: loop header
LB: loop body
LE: loop exit
PB: predicated region body
PF: predicated region fallthrough
CT: control target
= control target key end

     0   :  { %v157_v2 = vmov 0   ;;  %s209_s0 = inlined_call_operand.vmem [shape: bf16[4,32], index: 0, kind: input, shape index: {}]   ;;  %s210_s1 = inlined_call_operand.vmem [shape: bf16[32,192], index: 1, kind: input, shape index: {}]   ;;  %s211_s2 = inlined_call_operand.vmem [shape: f32[1,192], index: 2, kind: input, shape index: {}]   ;;  %s212_s3 = inlined_call_operand.hbm [shape: f32[4,192], index: 3, kind: output, shape index: {}]  }
   0x1   :  { %v127_v0 = vld [vmem:[%s210_s1 + $0x4] ss:$8 sps:$4 sm:$0xff]   ;;  %v129_v1 = vld [vmem:[%s210_s1] ss:$8 sps:$4 sm:$0xff]   ;;  %89 = vmatprep.mubr.bf16.mxu0 %v157_v2  ;;  %v130_v3 = vld [vmem:[%s210_s1 + $0x14] ss:$8 sps:$4 sm:$0xff]  }
   0x2   :  { %57 = vmatprep.subr.bf16.mxu0 %v127_v0  ;;  %v132_v4 = vld [vmem:[%s210_s1 + $0x10] ss:$8 sps:$4 sm:$0xff]  }
   0x3   :  { %58 = vmatpush1.bf16.msra.mxu0 %v129_v1 }
   0x4   :  { %8 = vsyncpa [#allocation3], 0  ;;  %59 = vmatprep.subr.bf16.mxu0 %v130_v3  ;;  %v16_v5 = vld [vmem:[%s209_s0] sm:$0x3]  ;;  %vm53_vm0 = vcmask 261120   ;;  %v23_v6 = vlaneseq  ;;  %vm102_vm1 = vcmask 1043456  }
   0x5   :  { %v21_v9 = vld [vmem:[%s211_s2] sm:$0x3]  ;;  %vm103_vm2 = vcmask 523268   ;;  %s158_s1 = smov [#allocation2]  }
   0x6   :  { %v24_v7 = vshrl.u32 %v23_v6, 7  ;;  %s112_s24 = sshll.u32 %s158_s1, 4  ;;  %vm104_vm3 = vmor %vm103_vm2, %vm102_vm1  ;;  %s113_s24 = int_to_ptr.vmem [resolvable:$true] %s112_s24 }
   0x7   :  { %60 = vmatpush1.bf16.msra.mxu0 %v132_v4  ;;  %s133_s0 = scalar_lea.vmem %s113_s24, 128  ;;  %p138_p1 = scmp.lt.s32.totalorder %s113_s24, %s113_s24 }
   0x8   :  { %v25_v8 = vsub.s32 0, %v24_v7  ;;  %v29_v10 = vsub.s32 1, %v24_v7  ;;  %p134_p0 = scmp.ne.s32.totalorder %s113_s24, %s133_s0  ;;  %p139_p2 = scmp.lt.s32.totalorder %s133_s0, %s133_s0 }
   0xa   :  { %124 = vmatmul.mubr.msk.bf16.vlgmr.msra.gmra.mrb[0].mxu0 %vm53_vm0, %v16_v5  ;;  %v26_v11 = vrot.slane %v21_v9, %v25_v8  ;;  %v30_v12 = vrot.slane %v21_v9, %v29_v10  ;;  %p140_p3 = por %p139_p2, %p138_p1 }
   0xc   :  { %p141_p4 = pnand %p140_p3, %p134_p0 }
  0xdd   :  { %v91_v13 = vpop.f32.mrb[0].mxu0 }
  0xde   :  { %v92_v14 = vadd.f32 %v91_v13, %v26_v11  ;;  %v93_v15 = vpop.f32.mrb[1].mxu0 }
  0xdf   :  { %v94_v16 = vadd.f32 %v93_v15, %v30_v12  ;;  %v95_v17 = vpop.f32.mrb[2].mxu0 }
  0xe0   :  { %v96_v18 = vpop.f32.mrb[3].mxu0 }
  0xe1   :  { %v100_v19 = vcombine.low %v92_v14, %v94_v16 }
  0xe3   :  { %105 = vst.msk [vmem:[#allocation2] sm:$0xff] %vm104_vm3, %v100_v19 }
  0xe4   :  { %144 = shalt.err (!%p141_p4)
}
  0xe5   :  { %s145_s26 = scalar_lea.hbm %s212_s3, 128 }
  0xe6   :  { %p146_p5 = scmp.ne.s32.totalorder %s212_s3, %s145_s26  ;;  %p149_p6 = scmp.lt.u32.totalorder %s145_s26, %s212_s3 }
  0xe8   :  { %p151_p7 = pnand %p149_p6, %p146_p5 }
  0xea   :  { %154 = shalt.err (!%p151_p7)
}
  0xeb   :  { %115 = dma.vmem_to_hbm [thread:$0]  %s113_s24, 128, %s212_s3, [#allocation3]  }
  0xec   :  { %155 = dma.done.wait [#allocation3], 128  }
  0xed   :  { %156 = vsyncadd [#allocation3], 4294967168 }
  0xee   :  { %119 = vsyncpa [#allocation3], 1 }

// kernel: ada_layer_norm_single.2
= control target key start
LH: loop header
LB: loop body
LE: loop exit
PB: predicated region body
PF: predicated region fallthrough
CT: control target
= control target key end

     0   :  { %v662_v1 = vmov 0   ;;  %s814_s0 = inlined_call_operand.vmem [shape: f32[4,1], index: 0, kind: input, shape index: {}]   ;;  %s815_s1 = inlined_call_operand.vmem [shape: f32[1,128], index: 1, kind: input, shape index: {}]   ;;  %s816_s2 = inlined_call_operand.vmem [shape: bf16[256,32], index: 2, kind: input, shape index: {}]   ;;  %s817_s3 = inlined_call_operand.vmem [shape: f32[1,32], index: 3, kind: input, shape index: {}]   ;;  %s818_s4 = inlined_call_operand.vmem [shape: bf16[32,32], index: 4, kind: input, shape index: {}]   ;;  %s819_s5 = inlined_call_operand.vmem [shape: f32[1,32], index: 5, kind: input, shape index: {}]   ;;  %s820_s6 = inlined_call_operand.hbm [shape: f32[4,32], index: 6, kind: output, shape index: {0}]   ;;  %s821_s7 = inlined_call_operand.vmem [shape: bf16[4,32], index: 7, kind: output, shape index: {1}]  }
   0x1   :  { %v27_v0 = vld [vmem:[%s814_s0] sm:$0xf]  ;;  %607 = vset.pattern.permute.xlu0 %v662_v1 }
   0x2   :  { %31 = vperm.xlu0 %607, %v27_v0  }
   0x3   :  { %13 = vsyncpa [#allocation3], 0  ;;  %v608_v2 = vld [vmem:[%s816_s2 + $0x40] sm:$0xff]   ;;  %v610_v4 = vld [vmem:[%s816_s2 + $0x48] sm:$0xff]   ;;  %v663_v32 = vmov 2102212464  }
   0x4   :  { %v609_v3 = vld [vmem:[%s816_s2] sm:$0xff]   ;;  %560 = vmatprep.subr.bf16.mxu0 %v608_v2  ;;  %v611_v5 = vld [vmem:[%s816_s2 + $0x8] sm:$0xff]   ;;  %v612_v6 = vld [vmem:[%s816_s2 + $0x50] sm:$0xff]   ;;  %v664_v34 = vmov 920167782  }
   0x5   :  { %561 = vmatpush3.bf16.msra.mxu0 %v609_v3  ;;  %v613_v7 = vld [vmem:[%s816_s2 + $0x10] sm:$0xff]   ;;  %v614_v8 = vld [vmem:[%s816_s2 + $0x58] sm:$0xff]   ;;  %v616_v10 = vld [vmem:[%s816_s2 + $0x60] sm:$0xff]   ;;  %v665_v38 = vmov 1326507024  }
   0x6   :  { %562 = vmatprep.subr.bf16.mxu0 %v610_v4  ;;  %v615_v9 = vld [vmem:[%s816_s2 + $0x18] sm:$0xff]   ;;  %v617_v11 = vld [vmem:[%s816_s2 + $0x20] sm:$0xff]   ;;  %v618_v12 = vld [vmem:[%s816_s2 + $0x68] sm:$0xff]   ;;  %v666_v40 = vmov 683565275  }
   0x7   :  { %v619_v13 = vld [vmem:[%s816_s2 + $0x28] sm:$0xff]   ;;  %v620_v14 = vld [vmem:[%s816_s2 + $0x70] sm:$0xff]   ;;  %v622_v16 = vld [vmem:[%s816_s2 + $0x78] sm:$0xff]   ;;  %v667_v42 = vmov 2475754826  }
   0x8   :  { %v621_v15 = vld [vmem:[%s816_s2 + $0x30] sm:$0xff]   ;;  %v623_v17 = vld [vmem:[%s816_s2 + $0x38] sm:$0xff]   ;;  %v530_v18 = vld [vmem:[%s815_s1] ss:$0 sm:$0xff]  ;;  %v668_v45 = vmov 2131351028  }
   0x9   :  { %563 = vmatpush3.bf16.msra.mxu0 %v611_v5 }
   0xa   :  { %564 = vmatprep.subr.bf16.mxu0 %v612_v6 }
   0xd   :  { %565 = vmatpush3.bf16.msra.mxu0 %v613_v7 }
   0xe   :  { %566 = vmatprep.subr.bf16.mxu0 %v614_v8 }
  0x11   :  { %567 = vmatpush3.bf16.msra.mxu0 %v615_v9 }
  0x12   :  { %568 = vmatprep.subr.bf16.mxu0 %v616_v10 }
  0x15   :  { %569 = vmatpush3.bf16.msra.mxu0 %v617_v11 }
  0x16   :  { %570 = vmatprep.subr.bf16.mxu0 %v618_v12 }
  0x19   :  { %571 = vmatpush3.bf16.msra.mxu0 %v619_v13 }
  0x1a   :  { %572 = vmatprep.subr.bf16.mxu0 %v620_v14 }
  0x1d   :  { %573 = vmatpush3.bf16.msra.mxu0 %v621_v15 }
  0x1e   :  { %574 = vmatprep.subr.bf16.mxu0 %v622_v16 }
  0x21   :  { %575 = vmatpush3.bf16.msra.mxu0 %v623_v17 }
  0x81   :  { %v32_v19 = vpop.permute.xlu0 %31 }
  0x82   :  { %v766_v20 = vmul.f32 %v530_v18, %v32_v19 }
  0x84   :  { %v44_v21 = vand.u32 2139095040, %v766_v20  ;;  %v41_v22 = vand.u32 2147483647, %v766_v20  ;;  %vm43_vm7 = vcmp.lt.s32.totalorder %v766_v20, 0  ;;  %vm133_vm15 = vweird.f32 %v766_v20 }
  0x86   :  { %v45_v23 = vshrl.u32 %v44_v21, 23  ;;  %v48_v25 = vand.u32 8388607, %v41_v22  ;;  %vm42_vm8 = vcmp.le.f32.partialorder %v41_v22, 0.7853982 }
  0x88   :  { %v531_v24 = vadd.s32 4294967169, %v45_v23  ;;  %v49_v28 = vor.u32 8388608, %v48_v25 }
  0x8a   :  { %v51_v26 = vadd.s32 1, %v531_v24  ;;  %v89_v36 = vshll.u32 %v49_v28, 8 }
  0x8c   :  { %vm52_vm0 = vcmp.gt.s32.totalorder %v51_v26, 0 }
  0x8d   :  { %v53_v27 = vsel %vm52_vm0, %v51_v26, 0  ;;  %vm670_vm0 = vmmov 0  }
  0x8e   :  { %v55_v29 = vand.u32 31, %v53_v27  ;;  %v54_v30 = vshrl.u32 %v53_v27, 5 }
  0x90   :  { %v56_v31 = vsub.s32 32, %v55_v29  ;;  %v67_v33 = vshll.u32 %v663_v32, %v55_v29  ;;  %v70_v35 = vshll.u32 %v664_v34, %v55_v29  ;;  %v58_v41 = vshll.u32 %v666_v40, %v55_v29 }
  0x91   :  { %v61_v44 = vshll.u32 %v667_v42, %v55_v29  ;;  %v64_v47 = vshll.u32 %v668_v45, %v55_v29  ;;  %vm76_vm1 = vcmp.lt.s32.totalorder %v54_v30, 4  ;;  %vm73_vm2 = vcmp.lt.s32.totalorder %v54_v30, 1 }
  0x92   :  { %v68_v37 = vshrl.u32 %v664_v34, %v56_v31  ;;  %v71_v39 = vshrl.u32 %v665_v38, %v56_v31  ;;  %v59_v43 = vshrl.u32 %v667_v42, %v56_v31  ;;  %v62_v46 = vshrl.u32 %v668_v45, %v56_v31 }
  0x93   :  { %v65_v48 = vshrl.u32 %v663_v32, %v56_v31  ;;  %v57_v52 = vshrl.u32 %v666_v40, %v56_v31  ;;  %vm74_vm3 = vcmp.lt.s32.totalorder %v54_v30, 2  ;;  %vm75_vm4 = vcmp.lt.s32.totalorder %v54_v30, 3 }
  0x94   :  { %v69_v49 = vor.u32 %v68_v37, %v67_v33  ;;  %v72_v50 = vor.u32 %v71_v39, %v70_v35  ;;  %v60_v51 = vor.u32 %v59_v43, %v58_v41  ;;  %v63_v53 = vor.u32 %v62_v46, %v61_v44 }
  0x95   :  { %v66_v54 = vor.u32 %v65_v48, %v64_v47 }
  0x96   :  { %v82_v55 = vsel %vm76_vm1, %v69_v49, 920167782  ;;  %v86_v56 = vsel %vm76_vm1, %v72_v50, 1326507024  ;;  %v81_v58 = vsel %vm73_vm2, %v60_v51, %v63_v53  ;;  %v77_v61 = vsel %vm73_vm2, %v57_v52, %v60_v51 }
  0x97   :  { %v78_v57 = vsel %vm76_vm1, %v66_v54, 2102212464  ;;  %v83_v59 = vsel %vm75_vm4, %v66_v54, %v82_v55  ;;  %v85_v60 = vsel %vm73_vm2, %v63_v53, %v66_v54  ;;  %v87_v0 = vsel %vm75_vm4, %v69_v49, %v86_v56  ;;  %v624_v56 = vld [vmem:[%s818_s4] sm:$0xff]  }
  0x98   :  { %v79_v62 = vsel %vm75_vm4, %v63_v53, %v78_v57  ;;  %v84_v63 = vsel %vm74_vm3, %v81_v58, %v83_v59  ;;  %v88_v1 = vsel %vm74_vm3, %v85_v60, %v87_v0  ;;  %v669_v57 = vmov 0.0   ;;  %v539_v59 = vld [vmem:[%s817_s3] ss:$0 sm:$0xff]  ;;  %s671_s3 = smov [#allocation2]  }
  0x99   :  { %v772_v2 = vmul.u32.u64.low %v89_v36, %v84_v63  ;;  %v773_v3 = vmul.u32.u64.high %v89_v36, %v84_v63, %v772_v2  ;;  %v775_v4 = vmul.u32.u64.low %v89_v36, %v88_v1  ;;  %v776_v5 = vmul.u32.u64.high %v89_v36, %v88_v1, %v775_v4  ;;  %585 = vmatprep.subr.bf16.mxu1 %v669_v57  ;;  %589 = vmatprep.mubr.msk.bf16.mxu1 %vm670_vm0, %v669_v57  ;;  %s518_s17 = sshll.u32 %s671_s3, 4  ;;  %s519_s17 = int_to_ptr.vmem [resolvable:$true] %s518_s17 }
  0x9a   :  { %v80_v6 = vsel %vm74_vm3, %v77_v61, %v79_v62  ;;  %586 = vmatpush3.bf16.msra.mxu1 %v624_v56  ;;  %vm456_vm1 = vcmask 261120   ;;  %vm500_vm2 = vcmask 257024   ;;  %s638_s18 = scalar_lea.vmem %s519_s17, 64  ;;  %p643_p1 = scmp.lt.s32.totalorder %s519_s17, %s519_s17 }
  0x9b   :  { %v99_v7 = vadd.s32 1, %v773_v3  ;;  %v96_v8 = vmul.u32 %v89_v36, %v80_v6  ;;  %vm98_vm5 = vc.u32 %v776_v5, %v772_v2  ;;  %v97_v21 = vadd.s32 %v772_v2, %v776_v5  ;;  %587 = vmatprep.subr.bf16.mxu1 %v669_v57  ;;  %p639_p0 = scmp.ne.s32.totalorder %s519_s17, %s638_s18  ;;  %p644_p2 = scmp.lt.s32.totalorder %s638_s18, %s638_s18 }
  0x9d   :  { %v100_v9 = vsel %vm98_vm5, %v99_v7, %v773_v3  ;;  %p645_p3 = por %p644_p2, %p643_p1 }
  0x9e   :  { %v101_v10 = vadd.s32 %v100_v9, %v96_v8  ;;  %v556_v8 = vld [vmem:[%s819_s5] ss:$0 sm:$0xff] }
  0x9f   :  { %p646_p4 = pnand %p645_p3, %p639_p0 }
  0xa0   :  { %v102_v11 = vadd.s32 536870912, %v101_v10 }
  0xa2   :  { %v103_v12 = vshrl.u32 %v102_v11, 30 }
  0xa4   :  { %v104_v13 = vshll.u32 %v103_v12, 30  ;;  %v127_v34 = vsub.s32 4, %v103_v12 }
  0xa6   :  { %v105_v14 = vsub.s32 %v101_v10, %v104_v13  ;;  %v128_v37 = vsel %vm43_vm7, %v127_v34, %v103_v12 }
  0xa7   :  { %v130_v39 = vsel %vm42_vm8, 0, %v128_v37 }
  0xa8   :  { %v107_v15 = vsub.s32 0, %v105_v14  ;;  %v237_v40 = vadd.s32 3, %v130_v39  ;;  %v134_v41 = vand.u32 3, %v130_v39 }
  0xaa   :  { %v532_v16 = vmin.u32 %v107_v15, %v105_v14  ;;  %v238_v42 = vand.u32 3, %v237_v40  ;;  %vm139_vm9 = vcmp.eq.s32.totalorder %v134_v41, 2  ;;  %vm136_vm11 = vcmp.eq.s32.totalorder %v134_v41, 0 }
  0xab   :  { %vm135_vm13 = vcmp.lt.s32.totalorder %v134_v41, 2 }
  0xac   :  { %v109_v17 = vclz %v532_v16  ;;  %vm243_vm10 = vcmp.eq.s32.totalorder %v238_v42, 2  ;;  %vm240_vm12 = vcmp.eq.s32.totalorder %v238_v42, 0  ;;  %vm239_vm14 = vcmp.lt.s32.totalorder %v238_v42, 2 }
  0xae   :  { %v533_v18 = vadd.s32 4294967294, %v109_v17 }
  0xb0   :  { %vm534_vm6 = vcmp.lt.s32.totalorder %v533_v18, 0 }
  0xb1   :  { %v112_v19 = vsel %vm534_vm6, 0, %v533_v18 }
  0xb2   :  { %v113_v23 = vsub.s32 32, %v112_v19  ;;  %v117_v24 = vsub.s32 4294967266, %v112_v19  ;;  %v114_v25 = vshll.u32 %v105_v14, %v112_v19 }
  0xb4   :  { %v115_v26 = vshrl.u32 %v97_v21, %v113_v23  ;;  %v118_v27 = vadd.s32 127, %v117_v24 }
  0xb6   :  { %v116_v28 = vor.u32 %v115_v26, %v114_v25  ;;  %v119_v29 = vshll.u32 %v118_v27, 23 }
  0xb8   :  { %v120_v30 = vor.u32 4788187, %v119_v29  ;;  %v123_v32 = vcvt.s32.f32 %v116_v28 }
  0xba   :  { %v121_v31 = vand.u32 2147483647, %v120_v30 }
  0xbc   :  { %v124_v33 = vmul.f32 %v123_v32, %v121_v31 }
  0xbe   :  { %v125_v35 = vxor.u32 2147483648, %v124_v33 }
  0xc0   :  { %v126_v36 = vsel %vm43_vm7, %v125_v35, %v124_v33 }
  0xc1   :  { %v129_v38 = vsel %vm42_vm8, %v766_v20, %v126_v36  ;;  %v625_v20 = vld [vmem:[%s818_s4 + $0x8] sm:$0xff]  }
  0xc2   :  { %626 = vcosq.f32 %v129_v38  ;;  %588 = vmatpush3.bf16.msra.mxu1 %v625_v20 }
  0xc3   :  { %628 = vsinq.f32 %v129_v38 }
  0xcc   :  { %v627_v43 = vpop.eup %626 }
  0xcd   :  { %v629_v44 = vpop.eup %628  ;;  %v140_v45 = vxor.u32 2147483648, %v627_v43 }
  0xce   :  { %v137_v46 = vxor.u32 2147483648, %v629_v44 }
  0xcf   :  { %v141_v47 = vsel %vm139_vm9, %v140_v45, %v629_v44  ;;  %v245_v22 = vsel %vm243_vm10, %v140_v45, %v629_v44 }
  0xd0   :  { %v138_v48 = vsel %vm136_vm11, %v627_v43, %v137_v46  ;;  %v242_v49 = vsel %vm240_vm12, %v627_v43, %v137_v46 }
  0xd1   :  { %v142_v50 = vsel %vm135_vm13, %v138_v48, %v141_v47  ;;  %v246_v51 = vsel %vm239_vm14, %v242_v49, %v245_v22 }
  0xd2   :  { %v143_v52 = vsel %vm133_vm15, nan, %v142_v50  ;;  %v247_v53 = vsel %vm133_vm15, nan, %v246_v51 }
  0xd3   :  { %v248_v54 = vpack.c.bf16 %v143_v52, %v143_v52  ;;  %v249_v55 = vpack.c.bf16 %v247_v53, %v247_v53 }
  0xd5   :  { %417 = vmatprep.mubr.bf16.mxu0 %v249_v55 }
  0xd6   :  { %418 = vmatmul.mubr.bf16.vlgmr.msra.gmra.mrb[0].mxu0 %v248_v54 }
 0x1a9   :  { %v576_v58 = vpop.f32.mrb[0].mxu0 }
 0x1aa   :  { %v577_v60 = vpop.f32.mrb[1].mxu0 }
 0x1ab   :  { %v578_v61 = vadd.f32 %v577_v60, %v576_v58  ;;  %v579_v62 = vpop.f32.mrb[2].mxu0 }
 0x1ac   :  { %v580_v63 = vpop.f32.mrb[3].mxu0 }
 0x1ad   :  { %v420_v0 = vadd.f32 %v578_v61, %v539_v59 }
 0x1af   :  { %v425_v1 = vsub.f32 0.0, %v420_v0 }
 0x1b1   :  { %v426_v2 = vmul.f32 1.442695, %v425_v1 }
 0x1b3   :  { %630 = vpow2.f32 %v426_v2 }
 0x1bd   :  { %v631_v3 = vpop.eup %630 }
 0x1be   :  { %v428_v4 = vadd.f32 1.0, %v631_v3 }
 0x1c0   :  { %632 = vrcp.f32 %v428_v4 }
 0x1ca   :  { %v633_v5 = vpop.eup %632 }
 0x1cb   :  { %v431_v6 = vmul.f32 %v633_v5, %v420_v0 }
 0x1cd   :  { %v432_v7 = vpack.c.bf16 %v431_v6, %v431_v6 }
 0x1cf   :  { %590 = vmatmul.mubr.msk.bf16.vlgmr.msra.gmra.mrb[0].mxu1 %vm456_vm1, %v432_v7 }
 0x2a2   :  { %v494_v9 = vpop.f32.mrb[0].mxu1 }
 0x2a3   :  { %v495_v10 = vadd.f32 %v556_v8, %v494_v9  ;;  %v591_v11 = vpop.f32.mrb[1].mxu1 }
 0x2a4   :  { %v497_v12 = vpop.f32.mrb[2].mxu1 }
 0x2a5   :  { %v502_v13 = vsub.f32 0.0, %v495_v10  ;;  %v592_v14 = vpop.f32.mrb[3].mxu1  ;;  %501 = vst.msk [vmem:[#allocation2] sm:$0xf] %vm500_vm2, %v495_v10 }
 0x2a6   :  { %649 = shalt.err (!%p646_p4)
}
 0x2a7   :  { %s650_s20 = scalar_lea.hbm %s820_s6, 64 }
 0x2a8   :  { %p651_p5 = scmp.ne.s32.totalorder %s820_s6, %s650_s20  ;;  %p654_p6 = scmp.lt.u32.totalorder %s650_s20, %s820_s6 }
 0x2aa   :  { %p656_p7 = pnand %p654_p6, %p651_p5 }
 0x2ac   :  { %659 = shalt.err (!%p656_p7)
}
 0x2ad   :  { %521 = dma.vmem_to_hbm [thread:$0]  %s519_s17, 64, %s820_s6, [#allocation3]   ;;  %v503_v15 = vmul.f32 1.442695, %v502_v13  ;;  %vm510_vm3 = vcmask 254976  }
 0x2af   :  { %634 = vpow2.f32 %v503_v15 }
 0x2b9   :  { %v635_v16 = vpop.eup %634 }
 0x2ba   :  { %v505_v17 = vadd.f32 1.0, %v635_v16 }
 0x2bc   :  { %636 = vrcp.f32 %v505_v17 }
 0x2c6   :  { %v637_v18 = vpop.eup %636 }
 0x2c7   :  { %v508_v19 = vmul.f32 %v637_v18, %v495_v10 }
 0x2c9   :  { %v509_v21 = vpack.c.bf16 %v508_v19, %v508_v19 }
 0x2cb   :  { %511 = vst.msk [vmem:[%s821_s7] sm:$0x3] %vm510_vm3, %v509_v21 }
 0x2cc   :  { %660 = dma.done.wait [#allocation3], 64  }
 0x2cd   :  { %661 = vsyncadd [#allocation3], 4294967232 }
 0x2ce   :  { %529 = vsyncpa [#allocation3], 1 }

</bundles_post_ra>
